<compile_context>
chip_gen: v7x
topology: tpu7x:2x2x1
jax: 0.10.0
libtpu: 0.0.40
codegen_flags: <defaults>
</compile_context>

<pallas_src>
import jax
import jax.numpy as jnp
from jax import lax
from jax.experimental import pallas as pl
from jax.experimental.pallas import tpu as pltpu

EPS = 1e-5
EXPANSION = 4


def _vmem_caps():
    """(per-kernel tile budget, vmem_limit_bytes), adapted per chip generation.

    v5e/v6e: 128 MiB physical VMEM -> 48 MiB tile budget, 96 MiB scoped limit.
    v7x:      64 MiB physical VMEM -> 24 MiB tile budget, 48 MiB scoped limit.
    """
    try:
        cap = pltpu.get_tpu_info().vmem_capacity_bytes
    except Exception:  # conservative (v7x-sized) fallback
        cap = 64 * 1024 * 1024
    if cap >= 96 * 1024 * 1024:
        return 48 * 1024 * 1024, 96 * 1024 * 1024
    return 24 * 1024 * 1024, 48 * 1024 * 1024


# ---------------------------------------------------------------------------
# Kernel 1: conv1 (1x1) -> column-padded bf16 activation + BN1 partial stats.
# ---------------------------------------------------------------------------
def _k1_conv1(x_ref, w1_ref, h1_ref, st_ref):
    th, Wp, P = h1_ref.shape
    W = Wp - 2
    # In-kernel bf16 cast of x (hides under the MXU; no separate XLA cast pass).
    x2d = x_ref[...].astype(jnp.bfloat16)                       # (th*W, Cin)
    y = jnp.dot(x2d, w1_ref[...], preferred_element_type=jnp.float32)
    # Per-tile partial BN statistics from the f32 matmul result (pre-rounding).
    st_ref[pl.ds(0, 1), :] = jnp.sum(y, axis=0, keepdims=True)
    st_ref[pl.ds(1, 1), :] = jnp.sum(y * y, axis=0, keepdims=True)
    # Column-padded (W+2) bf16 store so conv2 can assemble its window flat.
    h1_ref[:, pl.ds(1, W), :] = y.astype(jnp.bfloat16).reshape(th, W, P)
    zcol = jnp.zeros((th, 1, P), jnp.bfloat16)
    h1_ref[:, pl.ds(0, 1), :] = zcol
    h1_ref[:, pl.ds(W + 1, 1), :] = zcol


# ---------------------------------------------------------------------------
# Kernel 2: bn1+relu -> conv2 (3x3, pad=1) -> bf16 activation + BN2 stats.
# ---------------------------------------------------------------------------
def _k2_conv3x3(main_ref, top_ref, bot_ref, s1_ref, t1_ref, w2_ref,
                h2_ref, st_ref, pbuf_ref):
    th, Wp, P = main_ref.shape
    W = h2_ref.shape[1]
    i = pl.program_id(1)
    n_tiles = pl.num_programs(1)
    L = th * Wp

    scale = s1_ref[...].reshape(1, 1, P)
    # Column-masked shift: h1's halo columns are exact zeros (stored by k1), so
    # zeroing the shift there makes relu(0*scale + 0) == 0 -> true zero padding
    # for the convolution with no per-element masking ops in the BN path.
    col = lax.broadcasted_iota(jnp.int32, (1, Wp, P), 1)
    interior = jnp.logical_and(col > 0, col < Wp - 1)
    shift_c = jnp.where(interior, t1_ref[...].reshape(1, 1, P), 0.0)  # (1,Wp,P)

    def bn1_relu(v):
        return jnp.maximum(v.astype(jnp.float32) * scale + shift_c, 0.0)

    # interior rows -> padded rows [1, th+1)  (single contiguous store)
    pbuf_ref[pl.ds(Wp, L), :] = bn1_relu(main_ref[...]).reshape(L, P)

    zrow = jnp.zeros((Wp, P), jnp.float32)

    # top halo row (padded row 0): previous image row, or zeros at the border
    @pl.when(i == 0)
    def _():
        pbuf_ref[pl.ds(0, Wp), :] = zrow

    @pl.when(i > 0)
    def _():
        pbuf_ref[pl.ds(0, Wp), :] = bn1_relu(top_ref[...]).reshape(Wp, P)

    # bottom halo row (padded row th+1): next image row, or zeros at border
    @pl.when(i == n_tiles - 1)
    def _():
        pbuf_ref[pl.ds((th + 1) * Wp, Wp), :] = zrow

    @pl.when(i < n_tiles - 1)
    def _():
        pbuf_ref[pl.ds((th + 1) * Wp, Wp), :] = (
            bn1_relu(bot_ref[...]).reshape(Wp, P))

    # Only flat rows (th+2)*Wp and (th+2)*Wp+1 of the slack region are ever
    # read (by the dy=2 taps) and only into junk output columns sliced away
    # below -- zero just those two rows (hygiene).
    pbuf_ref[pl.ds((th + 2) * Wp, 2), :] = jnp.zeros((2, P), jnp.float32)

    # 9 shifted matmuls off the flat padded buffer, accumulated into a traced
    # f32 value (no VMEM read-modify-write accumulator).
    # TODO(synk): a bf16 pbuf would halve the scratch and drop the 9 per-tap
    # casts, but the dx=1 taps would need odd-sublane-offset loads of a packed
    # dtype; kept f32 so lowering is guaranteed on all generations.
    acc = jnp.zeros((L, P), jnp.float32)
    for t in range(9):
        dy, dx = divmod(t, 3)
        patch = pbuf_ref[pl.ds(dy * Wp + dx, L), :].astype(jnp.bfloat16)
        acc = acc + jnp.dot(patch, w2_ref[t],
                            preferred_element_type=jnp.float32)

    # INVARIANT: acc row j maps to (output row j // Wp, padded col j % Wp).
    # Padded columns W and W+1 mix halo-column / slack-row reads and are junk;
    # they MUST be sliced away before stats and the store.  Changing the tap
    # offsets or this slice requires re-deriving that invariant.
    h2 = acc.reshape(th, Wp, P)[:, :W, :]
    st_ref[pl.ds(0, 1), :] = jnp.sum(h2, axis=(0, 1), keepdims=True).reshape(1, P)
    st_ref[pl.ds(1, 1), :] = jnp.sum(h2 * h2, axis=(0, 1),
                                     keepdims=True).reshape(1, P)
    h2_ref[...] = h2.astype(h2_ref.dtype)


# ---------------------------------------------------------------------------
# Kernel 3: bn2+relu -> conv3 (1x1 expansion) -> bf16 activation + BN3 stats.
# ---------------------------------------------------------------------------
def _k3_conv3(h2_ref, s2_ref, t2_ref, w3_ref, h3_ref, st_ref):
    a = jnp.maximum(h2_ref[...].astype(jnp.float32) * s2_ref[...] + t2_ref[...],
                    0.0)
    y = jnp.dot(a.astype(jnp.bfloat16), w3_ref[...],
                preferred_element_type=jnp.float32)
    st_ref[pl.ds(0, 1), :] = jnp.sum(y, axis=0, keepdims=True)
    st_ref[pl.ds(1, 1), :] = jnp.sum(y * y, axis=0, keepdims=True)
    h3_ref[...] = y.astype(h3_ref.dtype)


# ---------------------------------------------------------------------------
# Kernel 4: bn3 + residual add + relu (all f32 element-wise math).
# ---------------------------------------------------------------------------
def _k4_bn3_residual(h3_ref, s3_ref, t3_ref, x_ref, o_ref):
    y = h3_ref[...].astype(jnp.float32) * s3_ref[...] + t3_ref[...]
    y = y + x_ref[...].astype(jnp.float32)
    o_ref[...] = jnp.maximum(y, 0.0).astype(o_ref.dtype)


# ---------------------------------------------------------------------------
# Wrapper
# ---------------------------------------------------------------------------
def _finalize_bn(partial_stats, gamma, beta, count):
    """Fold global training-mode BN stats into (scale, shift).

    Note: stats are computed from the f32 matmul outputs, while normalization
    is later applied to the bf16-rounded stored activations (tiny, documented
    inconsistency vs an exact reference).
    """
    s = jnp.sum(partial_stats[:, :, 0, :], axis=(0, 1))
    sq = jnp.sum(partial_stats[:, :, 1, :], axis=(0, 1))
    mean = s / count
    var = jnp.maximum(sq / count - mean * mean, 0.0)   # biased variance
    scale = gamma.reshape(-1) * lax.rsqrt(var + EPS)
    shift = beta.reshape(-1) - mean * scale
    return (scale.reshape(1, -1).astype(jnp.float32),
            shift.reshape(1, -1).astype(jnp.float32))


def _pick_row_tile(H, W, Cin, P, budget_bytes):
    """Largest divisor of H whose per-kernel VMEM working set (incl. double
    buffering) stays under the per-generation budget."""
    Wp = W + 2

    def est(th):
        # k1: x block f32 (dbuf) + h1 block bf16 (dbuf) + weights
        k1 = 2 * th * W * Cin * 4 + 2 * th * Wp * P * 2 + Cin * P * 2
        # k2: main/top/bot bf16 (dbuf) + h2 out bf16 (dbuf) + f32 pbuf scratch
        #     + traced f32 accumulator (may spill to VMEM) + weights (dbuf)
        k2 = (2 * th * Wp * P * 2 + 4 * Wp * P * 2 + 2 * th * W * P * 2
              + (th + 3) * Wp * P * 4 + th * Wp * P * 4 + 2 * 9 * P * P * 2)
        return max(k1, k2)

    best = 1
    for d in range(1, H + 1):
        if H % d == 0 and est(d) <= budget_bytes:
            best = d
    return best


def _pick_pixel_tile(HW, budget_bytes, bytes_per_pixel):
    """Largest multiple-of-8 divisor of H*W that fits the budget (or H*W)."""
    cap = max(budget_bytes // bytes_per_pixel, 1)
    if HW <= cap:
        return HW
    best = None
    for d in range(8, min(cap, HW) + 1, 8):
        if HW % d == 0:
            best = d
    return best if best is not None else HW


def bottleneck_forward_nhwc(x, params, row_tile=None, out_dtype=None):
    """Bottleneck forward (stride=1, downsample=None), NHWC activations."""
    N, H, W, Cin = x.shape
    w1, g1, b1, w2, g2, b2, w3, g3, b3 = params
    P = w1.shape[1]
    C4 = w3.shape[1]
    assert C4 == EXPANSION * P and Cin == C4, (
        "downsample=None requires inplanes == planes * expansion")
    out_dtype = x.dtype if out_dtype is None else out_dtype  # pass bf16 if the
    # downstream layer consumes bf16 (halves the final store).

    Wp = W + 2
    HW = H * W
    M = N * HW
    budget, vmem_limit = _vmem_caps()
    th = row_tile if row_tile is not None else _pick_row_tile(H, W, Cin, P, budget)
    assert H % th == 0
    assert (th * W) % 8 == 0 or th * W == HW, (
        "pick a row tile with th*W a multiple of 8 (flattened BlockSpecs)")
    nH = H // th
    grid_rows = (N, nH)
    cparams = pltpu.CompilerParams(
        dimension_semantics=("parallel", "parallel"),
        vmem_limit_bytes=vmem_limit)

    w1b = w1.astype(jnp.bfloat16)                     # (Cin, P)
    w2b = w2.reshape(9, P, P).astype(jnp.bfloat16)    # (kh,kw,in,out) -> (9,in,out)
    w3b = w3.astype(jnp.bfloat16)                     # (P, 4P)

    # Free contiguous-dim merge: keeps the 1x1/elementwise kernels reshape-free.
    x_flat = x.reshape(N, HW, Cin)

    # --- conv1 (1x1) -> bf16 column-padded h1 + BN1 partial stats ------------
    h1_pad, st1 = pl.pallas_call(
        _k1_conv1,
        grid=grid_rows,
        in_specs=[
            pl.BlockSpec((None, th * W, Cin), lambda n, i: (n, i, 0)),
            pl.BlockSpec((Cin, P), lambda n, i: (0, 0)),
        ],
        out_specs=(
            pl.BlockSpec((None, th, Wp, P), lambda n, i: (n, i, 0, 0)),
            pl.BlockSpec((None, None, 2, P), lambda n, i: (n, i, 0, 0)),
        ),
        out_shape=(
            jax.ShapeDtypeStruct((N, H, Wp, P), jnp.bfloat16),
            jax.ShapeDtypeStruct((N, nH, 2, P), jnp.float32),
        ),
        compiler_params=cparams,
        cost_estimate=pl.CostEstimate(
            flops=2 * M * Cin * P, transcendentals=0,
            bytes_accessed=(M * Cin * 4 + Cin * P * 2
                            + N * H * Wp * P * 2 + N * nH * 2 * P * 4)),
    )(x_flat, w1b)
    scale1, shift1 = _finalize_bn(st1, g1, b1, M)

    # --- bn1+relu -> conv2 (3x3) + BN2 partial stats ------------------------
    h2, st2 = pl.pallas_call(
        _k2_conv3x3,
        grid=grid_rows,
        in_specs=[
            pl.BlockSpec((None, th, Wp, P), lambda n, i: (n, i, 0, 0)),
            pl.BlockSpec((None, 1, Wp, P),
                         lambda n, i: (n, jnp.maximum(i * th - 1, 0), 0, 0)),
            pl.BlockSpec((None, 1, Wp, P),
                         lambda n, i: (n, jnp.minimum(i * th + th, H - 1), 0, 0)),
            pl.BlockSpec((1, P), lambda n, i: (0, 0)),
            pl.BlockSpec((1, P), lambda n, i: (0, 0)),
            pl.BlockSpec((9, P, P), lambda n, i: (0, 0, 0)),
        ],
        out_specs=(
            pl.BlockSpec((None, th, W, P), lambda n, i: (n, i, 0, 0)),
            pl.BlockSpec((None, None, 2, P), lambda n, i: (n, i, 0, 0)),
        ),
        out_shape=(
            jax.ShapeDtypeStruct((N, H, W, P), jnp.bfloat16),
            jax.ShapeDtypeStruct((N, nH, 2, P), jnp.float32),
        ),
        scratch_shapes=[
            pltpu.VMEM(((th + 3) * Wp, P), jnp.float32),   # flat padded rows
        ],
        compiler_params=cparams,
        cost_estimate=pl.CostEstimate(
            flops=2 * M * 9 * P * P, transcendentals=0,
            bytes_accessed=(N * (H + 2 * nH) * Wp * P * 2   # main + halo re-reads
                            + 9 * P * P * 2 + M * P * 2 + N * nH * 2 * P * 4)),
    )(h1_pad, h1_pad, h1_pad, scale1, shift1, w2b)
    scale2, shift2 = _finalize_bn(st2, g2, b2, M)

    # --- bn2+relu -> conv3 (1x1 expansion) + BN3 partial stats --------------
    bpp = max(4 * P + 4 * C4, 20 * C4)          # worst-case VMEM bytes / pixel
    tp = _pick_pixel_tile(HW, budget, bpp)
    nP = HW // tp
    grid_pix = (N, nP)
    h2_flat = h2.reshape(N, HW, P)               # free contiguous-dim merge

    h3, st3 = pl.pallas_call(
        _k3_conv3,
        grid=grid_pix,
        in_specs=[
            pl.BlockSpec((None, tp, P), lambda n, i: (n, i, 0)),
            pl.BlockSpec((1, P), lambda n, i: (0, 0)),
            pl.BlockSpec((1, P), lambda n, i: (0, 0)),
            pl.BlockSpec((P, C4), lambda n, i: (0, 0)),
        ],
        out_specs=(
            pl.BlockSpec((None, tp, C4), lambda n, i: (n, i, 0)),
            pl.BlockSpec((None, None, 2, C4), lambda n, i: (n, i, 0, 0)),
        ),
        out_shape=(
            jax.ShapeDtypeStruct((N, HW, C4), jnp.bfloat16),
            jax.ShapeDtypeStruct((N, nP, 2, C4), jnp.float32),
        ),
        compiler_params=cparams,
        cost_estimate=pl.CostEstimate(
            flops=2 * M * P * C4, transcendentals=0,
            bytes_accessed=(M * P * 2 + P * C4 * 2 + M * C4 * 2
                            + N * nP * 2 * C4 * 4)),
    )(h2_flat, scale2, shift2, w3b)
    scale3, shift3 = _finalize_bn(st3, g3, b3, M)

    # --- bn3 + residual add + relu -------------------------------------------
    out_flat = pl.pallas_call(
        _k4_bn3_residual,
        grid=grid_pix,
        in_specs=[
            pl.BlockSpec((None, tp, C4), lambda n, i: (n, i, 0)),
            pl.BlockSpec((1, C4), lambda n, i: (0, 0)),
            pl.BlockSpec((1, C4), lambda n, i: (0, 0)),
            pl.BlockSpec((None, tp, C4), lambda n, i: (n, i, 0)),
        ],
        out_specs=pl.BlockSpec((None, tp, C4), lambda n, i: (n, i, 0)),
        out_shape=jax.ShapeDtypeStruct((N, HW, C4), out_dtype),
        compiler_params=cparams,
        cost_estimate=pl.CostEstimate(
            flops=4 * M * C4, transcendentals=0,
            bytes_accessed=M * C4 * (2 + 4 + jnp.dtype(out_dtype).itemsize)),
    )(h3, scale3, shift3, x_flat)
    return out_flat.reshape(N, H, W, C4)


def bottleneck_forward_nchw(x_nchw, params, row_tile=None, out_dtype=None):
    """PyTorch-layout adapter only.  Keeping the surrounding model NHWC avoids
    these two full-tensor HBM transposes entirely."""
    x = jnp.transpose(x_nchw, (0, 2, 3, 1))
    out = bottleneck_forward_nhwc(x, params, row_tile=row_tile,
                                  out_dtype=out_dtype)
    return jnp.transpose(out, (0, 3, 1, 2))


# ---------------------------------------------------------------------------
# Params / pure-JAX reference
# ---------------------------------------------------------------------------
def init_params(key, inplanes, planes):
    """Deterministic synthetic params (torch conv layout -> matmul layouts)."""
    ks = jax.random.split(key, 9)
    w1_t = 0.1 * jax.random.normal(ks[0], (planes, inplanes, 1, 1), jnp.float32)
    w2_t = 0.1 * jax.random.normal(ks[1], (planes, planes, 3, 3), jnp.float32)
    w3_t = 0.1 * jax.random.normal(ks[2], (planes * EXPANSION, planes, 1, 1),
                                   jnp.float32)
    w1 = w1_t[:, :, 0, 0].T                       # (Cin, P)
    w2 = jnp.transpose(w2_t, (2, 3, 1, 0))        # (kh, kw, in, out)
    w3 = w3_t[:, :, 0, 0].T                       # (P, 4P)

    def affine(kw, kb, c):
        g = 1.0 + 0.1 * jax.random.normal(kw, (1, c), jnp.float32)
        b = 0.1 * jax.random.normal(kb, (1, c), jnp.float32)
        return g, b

    g1, b1 = affine(ks[3], ks[4], planes)
    g2, b2 = affine(ks[5], ks[6], planes)
    g3, b3 = affine(ks[7], ks[8], planes * EXPANSION)
    return (w1, g1, b1, w2, g2, b2, w3, g3, b3)


def bottleneck_reference(x, params):
    """Pure-JAX NHWC reference (training-mode BN, biased variance)."""
    w1, g1, b1, w2, g2, b2, w3, g3, b3 = params

    def bn(h, g, b):
        mean = jnp.mean(h, axis=(0, 1, 2), keepdims=True)
        var = jnp.mean((h - mean) ** 2, axis=(0, 1, 2), keepdims=True)
        return ((h - mean) * lax.rsqrt(var + EPS) * g.reshape(1, 1, 1, -1)
                + b.reshape(1, 1, 1, -1))

    h = jnp.einsum("nhwc,cp->nhwp", x, w1)
    h = jax.nn.relu(bn(h, g1, b1))
    h = lax.conv_general_dilated(h, w2, (1, 1), "SAME",
                                 dimension_numbers=("NHWC", "HWIO", "NHWC"))
    h = jax.nn.relu(bn(h, g2, b2))
    h = jnp.einsum("nhwp,pc->nhwc", h, w3)
    h = bn(h, g3, b3)
    return jax.nn.relu(h + x)


if __name__ == "__main__":
    key = jax.random.PRNGKey(0)
    k_x, k_p = jax.random.split(key)

    planes = 4
    inplanes = planes * EXPANSION   # 16, so the residual add is shape-compatible
    N, H, W = 2, 16, 16

    # NHWC activations end-to-end (avoids NCHW<->NHWC HBM transposes).
    x = jax.random.normal(k_x, (N, H, W, inplanes), jnp.float32)
    params = init_params(k_p, inplanes, planes)

    # row_tile=8 -> 2 row-tiles per image: exercises the conv2 halo exchange.
    out = bottleneck_forward_nhwc(x, params, row_tile=8)
    out = jax.block_until_ready(out)

    assert out.shape == (N, H, W, planes * EXPANSION)
    assert bool(jnp.all(out >= 0.0))  # final ReLU

    ref = bottleneck_reference(x, params)
    err = float(jnp.max(jnp.abs(out - ref)))
    assert err < 2.5e-1, f"kernel/reference mismatch: max abs err {err}"

    print("KERNEL_OK")
</pallas_src>

<mosaic_0001>
module attributes {stable_mosaic.version = 11 : i64} {
  func.func @_k1_conv1(%arg0: i32, %arg1: i32, %arg2: memref<1x128x16xf32, #tpu.memory_space<vmem>>, %arg3: memref<16x4xbf16, #tpu.memory_space<vmem>>, %arg4: memref<1x8x18x4xbf16, #tpu.memory_space<vmem>>, %arg5: memref<1x1x2x4xf32, #tpu.memory_space<vmem>>) attributes {dimension_semantics = [#tpu.dimension_semantics<parallel>, #tpu.dimension_semantics<parallel>], iteration_bounds = array<i64: 2, 2>, scalar_prefetch = 0 : i64, scratch_operands = 0 : i64, tpu.core_type = #tpu.core_type<tc>, window_params = [{transform_indices = @transform_0, window_bounds = array<i64: 1, 128, 16>}, {pipeline_mode = #tpu.pipeline_mode<synchronous>, transform_indices = @transform_1, window_bounds = array<i64: 16, 4>}, {transform_indices = @transform_2, window_bounds = array<i64: 1, 8, 18, 4>}, {transform_indices = @transform_3, window_bounds = array<i64: 1, 1, 2, 4>}]} {
    %c0 = arith.constant 0 : index
    %c0_0 = arith.constant 0 : index
    %c0_1 = arith.constant 0 : index
    %0 = vector.load %arg2[%c0, %c0_0, %c0_1] : memref<1x128x16xf32, #tpu.memory_space<vmem>>, vector<1x128x16xf32>
    %1 = vector.shape_cast %0 : vector<1x128x16xf32> to vector<128x16xf32>
    %2 = arith.truncf %1 : vector<128x16xf32> to vector<128x16xbf16>
    %c0_2 = arith.constant 0 : index
    %c0_3 = arith.constant 0 : index
    %3 = vector.load %arg3[%c0_2, %c0_3] : memref<16x4xbf16, #tpu.memory_space<vmem>>, vector<16x4xbf16>
    %cst = arith.constant dense<0.000000e+00> : vector<128x4xf32>
    %4 = tpu.matmul %2, %3, %cst {dimension_numbers = #tpu.dot_dimension_numbers<[1], [0], [0], [1], [0, 0, 1, 1], [], []>} : vector<128x16xbf16>, vector<16x4xbf16>, vector<128x4xf32> -> vector<128x4xf32>
    %cst_4 = arith.constant dense<0.000000e+00> : vector<4xf32>
    %5 = vector.multi_reduction <add>, %4, %cst_4 [0] : vector<128x4xf32> to vector<4xf32>
    %6 = vector.shape_cast %5 : vector<4xf32> to vector<1x4xf32>
    %c0_5 = arith.constant 0 : index
    %c0_6 = arith.constant 0 : index
    %c0_7 = arith.constant 0 : index
    %c0_8 = arith.constant 0 : index
    %7 = vector.load %arg5[%c0_5, %c0_6, %c0_7, %c0_8] : memref<1x1x2x4xf32, #tpu.memory_space<vmem>>, vector<1x1x1x4xf32>
    %8 = vector.shape_cast %7 : vector<1x1x1x4xf32> to vector<1x4xf32>
    %9 = vector.shape_cast %6 : vector<1x4xf32> to vector<1x1x1x4xf32>
    tpu.vector_store %arg5[%c0_5, %c0_6, %c0_7, %c0_8], %9 {strides = array<i32>} : memref<1x1x2x4xf32, #tpu.memory_space<vmem>>, vector<1x1x1x4xf32>,
    %10 = arith.mulf %4, %4 : vector<128x4xf32>
    %cst_9 = arith.constant dense<0.000000e+00> : vector<4xf32>
    %11 = vector.multi_reduction <add>, %10, %cst_9 [0] : vector<128x4xf32> to vector<4xf32>
    %12 = vector.shape_cast %11 : vector<4xf32> to vector<1x4xf32>
    %c0_10 = arith.constant 0 : index
    %c0_11 = arith.constant 0 : index
    %c1 = arith.constant 1 : index
    %c0_12 = arith.constant 0 : index
    %13 = vector.load %arg5[%c0_10, %c0_11, %c1, %c0_12] : memref<1x1x2x4xf32, #tpu.memory_space<vmem>>, vector<1x1x1x4xf32>
    %14 = vector.shape_cast %13 : vector<1x1x1x4xf32> to vector<1x4xf32>
    %15 = vector.shape_cast %12 : vector<1x4xf32> to vector<1x1x1x4xf32>
    tpu.vector_store %arg5[%c0_10, %c0_11, %c1, %c0_12], %15 {strides = array<i32>} : memref<1x1x2x4xf32, #tpu.memory_space<vmem>>, vector<1x1x1x4xf32>,
    %16 = arith.truncf %4 : vector<128x4xf32> to vector<128x4xbf16>
    %17 = vector.shape_cast %16 : vector<128x4xbf16> to vector<8x16x4xbf16>
    %c0_13 = arith.constant 0 : index
    %c0_14 = arith.constant 0 : index
    %c1_15 = arith.constant 1 : index
    %c0_16 = arith.constant 0 : index
    %18 = vector.load %arg4[%c0_13, %c0_14, %c1_15, %c0_16] : memref<1x8x18x4xbf16, #tpu.memory_space<vmem>>, vector<1x8x16x4xbf16>
    %19 = vector.shape_cast %18 : vector<1x8x16x4xbf16> to vector<8x16x4xbf16>
    %20 = vector.shape_cast %17 : vector<8x16x4xbf16> to vector<1x8x16x4xbf16>
    tpu.vector_store %arg4[%c0_13, %c0_14, %c1_15, %c0_16], %20 {strides = array<i32>} : memref<1x8x18x4xbf16, #tpu.memory_space<vmem>>, vector<1x8x16x4xbf16>,
    %cst_17 = arith.constant 0.000000e+00 : bf16
    %21 = vector.broadcast %cst_17 : bf16 to vector<8x1x4xbf16>
    %c0_18 = arith.constant 0 : index
    %c0_19 = arith.constant 0 : index
    %c0_20 = arith.constant 0 : index
    %c0_21 = arith.constant 0 : index
    %22 = vector.load %arg4[%c0_18, %c0_19, %c0_20, %c0_21] : memref<1x8x18x4xbf16, #tpu.memory_space<vmem>>, vector<1x8x1x4xbf16>
    %23 = vector.shape_cast %22 : vector<1x8x1x4xbf16> to vector<8x1x4xbf16>
    %24 = vector.shape_cast %21 : vector<8x1x4xbf16> to vector<1x8x1x4xbf16>
    tpu.vector_store %arg4[%c0_18, %c0_19, %c0_20, %c0_21], %24 {strides = array<i32>} : memref<1x8x18x4xbf16, #tpu.memory_space<vmem>>, vector<1x8x1x4xbf16>,
    %c0_22 = arith.constant 0 : index
    %c0_23 = arith.constant 0 : index
    %c17 = arith.constant 17 : index
    %c0_24 = arith.constant 0 : index
    %25 = vector.load %arg4[%c0_22, %c0_23, %c17, %c0_24] : memref<1x8x18x4xbf16, #tpu.memory_space<vmem>>, vector<1x8x1x4xbf16>
    %26 = vector.shape_cast %25 : vector<1x8x1x4xbf16> to vector<8x1x4xbf16>
    %27 = vector.shape_cast %21 : vector<8x1x4xbf16> to vector<1x8x1x4xbf16>
    tpu.vector_store %arg4[%c0_22, %c0_23, %c17, %c0_24], %27 {strides = array<i32>} : memref<1x8x18x4xbf16, #tpu.memory_space<vmem>>, vector<1x8x1x4xbf16>,
    return
  }
  func.func @transform_0(%arg0: i32, %arg1: i32) -> (i32, i32, i32) {
    %c0_i32 = arith.constant 0 : i32
    %c0_i32_0 = arith.constant 0 : i32
    return %arg0, %arg1, %c0_i32 : i32, i32, i32
  }
  func.func @transform_1(%arg0: i32, %arg1: i32) -> (i32, i32) {
    %c0_i32 = arith.constant 0 : i32
    %c0_i32_0 = arith.constant 0 : i32
    %c0_i32_1 = arith.constant 0 : i32
    return %c0_i32, %c0_i32_0 : i32, i32
  }
  func.func @transform_2(%arg0: i32, %arg1: i32) -> (i32, i32, i32, i32) {
    %c0_i32 = arith.constant 0 : i32
    %c0_i32_0 = arith.constant 0 : i32
    %c0_i32_1 = arith.constant 0 : i32
    return %arg0, %arg1, %c0_i32, %c0_i32_0 : i32, i32, i32, i32
  }
  func.func @transform_3(%arg0: i32, %arg1: i32) -> (i32, i32, i32, i32) {
    %c0_i32 = arith.constant 0 : i32
    %c0_i32_0 = arith.constant 0 : i32
    %c0_i32_1 = arith.constant 0 : i32
    return %arg0, %arg1, %c0_i32, %c0_i32_0 : i32, i32, i32, i32
  }
}

</mosaic_0001>

<bundles_post_ra>
// kernel: tpu_custom_call.1
= control target key start
LH: loop header
LB: loop body
LE: loop exit
PB: predicated region body
PF: predicated region fallthrough
CT: control target
= control target key end

     0   :  { %9 = vsyncpa [#allocation3], 0  ;;  %s1704_s0 = inlined_call_operand.vmem [shape: f32[2,256,16], index: 0, kind: input, shape index: {}]   ;;  %s1705_s1 = inlined_call_operand.vmem [shape: bf16[16,4], index: 1, kind: input, shape index: {}]   ;;  %s1706_s2 = inlined_call_operand.vmem [shape: bf16[2,16,18,4], index: 2, kind: output, shape index: {0}]   ;;  %s1707_s3 = inlined_call_operand.hbm [shape: f32[2,2,2,4], index: 3, kind: output, shape index: {1}]  }
   0x1   :  { %11 = vsyncpa [#allocation3 + $0x1], 0  ;;  %s1223_s12 = smov 0   ;;  %s1225_s13 = smov 0  }
   0x2   :  { %s1227_s14 = smov 0   ;;  %s1229_s15 = smov 0  }
   0x3   :  { %s1231_s16 = smov 0   ;;  %s1233_s17 = smov 0  }
   0x4   :  { %s1235_s18 = smov 0   ;;  %s1237_s19 = smov 0  }
   0x5 LB: > { %s946_s20 = sadd.s32 4294967295, %s1200_s19   ;;  %s947_s21 = sadd.s32 4294967294, %s1200_s19   ;;  %s1200_s19 = sphi %s1237_s19, %s17_s19   ;;  %s1196_s18 = sphi %s1235_s18, %s1724_s18   ;;  %s1192_s17 = sphi %s1233_s17, %s1723_s17   ;;  %s1188_s16 = sphi %s1231_s16, %s1722_s16   ;;  %s1184_s15 = sphi %s1229_s15, %s1721_s15   ;;  %s1180_s14 = sphi %s1227_s14, %s1720_s14   ;;  %s1176_s13 = sphi %s1225_s13, %s1719_s13   ;;  %s1172_s12 = sphi %s1223_s12, %s1718_s12  }
   0x6   : > { %s26_s22 = sadd.s32 1, %s1192_s17  ;;  %s29_s23 = sadd.s32 1, %s1196_s18 }
   0x7   : > { %p27_p0 = scmp.ge.s32.totalorder %s26_s22, 2  ;;  %p125_p1 = scmp.ne.s32.totalorder %s1180_s14, %s1176_s13 }
   0x8   : > { %p126_p2 = scmp.eq.s32.totalorder %s946_s20, 3  ;;  %p131_p5 = scmp.ne.s32.totalorder %s1176_s13, %s1172_s12 }
   0x9   : > { %s1726_s22 = smov (%p27_p0, %s26_s22), 0  ;;  %s1728_s23 = smov (!%p27_p0, %s29_s23), %s1196_s18 }
   0xa   : > { %s111_s24 = ssub.s32 %s1192_s17, %s1726_s22  ;;  %p1274_p3 = por %p126_p2, %p125_p1 }
   0xb   : > { %p31_p4 = scmp.ge.s32.totalorder %s1728_s23, 2  ;;  %p132_p6 = scmp.eq.s32.totalorder %s947_s21, 3 }
   0xc   : > { %p950_p7 = scmp.ge.s32.totalorder %s1200_s19, 1  ;;  %p166_p9 = scmp.lt.s32.totalorder %s1200_s19, 5 }
   0xd   : > { %s1730_s23 = smov (%p31_p4, %s1728_s23), 0  ;;  %p1283_p8 = por %p132_p6, %p131_p5 }
   0xe   : > { %s110_s27 = ssub.s32 %s1196_s18, %s1730_s23  ;;  %s115_s28 = sadd.s32 1, %s1180_s14 }
   0xf   : > { %s112_s29 = sor.u32 %s111_s24, %s110_s27  ;;  %p167_p10 = pnand %p950_p7, %p166_p9 }
  0x10   : > { %p113_p11 = scmp.eq.s32.totalorder %s112_s29, 0  ;;  %v1105_v0 = vld [vmem:[%s1705_s1] sm:$0xff] (!%p167_p10)   ;;  %s952_s6 = sshll.u32 (!%p167_p10), %s1184_s15, 4  ;;  %vm258_vm0 = vcmask (!%p167_p10), 130048   ;;  %vm380_vm1 = vcmask (!%p167_p10), 31744   ;;  %vm685_vm2 = vcmask (!%p167_p10), 27648  }
  0x11   : > { %170 = sbr.rel (%p167_p10) target bundleno = 325 (0x145), region = 28  ;;  %p205_p12 = scmp.lt.s32.totalorder (!%p167_p10), %s1188_s16, 1  ;;  %1012 = vmatprep.subr.bf16.mxu0 (!%p167_p10), %v1105_v0  ;;  %1030 = vmatprep.subr.bf16.mxu1 (!%p167_p10), %v1105_v0  ;;  %vm686_vm3 = vsmask.f32 (!%p167_p10), 7938  ;;  %vm522_vm4 = vsmask.f32 (!%p167_p10), 256 }
  0x12   : > { %s1292_s30 = scalar_select %p113_p11, %s1180_s14, %s115_s28  }
  0x13   : > { %p207_p13 = scmp.lt.s32.totalorder (!%p167_p10), %s952_s6, 31  ;;  %1013 = vmatpush3.bf16.msra.mxu0 (!%p167_p10), %v1105_v0  ;;  %1031 = vmatpush3.bf16.msra.mxu1 (!%p167_p10), %v1105_v0  ;;  %s955_s24 = sshll.u32 (!%p167_p10), %s1184_s15, 3  ;;  %vm523_vm5 = vsmask.f32 (!%p167_p10), 4368  ;;  %vm1335_vm6 = vmand (!%p167_p10), %vm685_vm2, %vm686_vm3  ;;  %vm418_vm8 = vcmask (!%p167_p10), 24576  }
  0x14   : > { %p217_p0 = scmp.lt.s32.totalorder (!%p167_p10), %s955_s24, 15  ;;  %vm1354_vm7 = vmor (!%p167_p10), %vm522_vm4, %vm523_vm5 }
  0x15   : > { %vm1491_vm9 = vmand (!%p167_p10), %vm418_vm8, %vm522_vm4 }
  0x16   : > { %vm1570_vm10 = vmand (!%p167_p10), %vm418_vm8, %vm686_vm3 }
  0x18   : > { %s1300_s7 = scalar_select %p205_p12, %s1188_s16, 1 }
  0x19   : > { %s1732_s6 = smov (!%p207_p13, %s952_s6), 31  ;;  %s1734_s24 = smov (!%p217_p0, %s955_s24), 15 }
  0x1a   : > { %s953_s8 = sshll.u32 %s1300_s7, 5  ;;  %s1033_s27 = smul.u32 48, %s1300_s7 }
  0x1b   : > { %s210_s9 = sadd.s32 %s953_s8, %s1732_s6  ;;  %s1032_s28 = smul.u32 3, %s1734_s24 }
  0x1c   : > { %s954_s10 = sshll.u32 %s210_s9, 3  ;;  %s201_s8 = sand.u32 1, %s1176_s13  }
  0x1d   : > { %s212_s21 = scalar_lea.vmem %s1704_s0, %s954_s10  ;;  %s221_s29 = sadd.s32 %s1033_s27, %s1032_s28 }
  0x1e   : > { %v226_v1 = vld [vmem:[%s212_s21] sm:$0xff]  ;;  %v227_v2 = vld [vmem:[%s212_s21 + $0x8] sm:$0xff]  ;;  %v228_v3 = vld [vmem:[%s212_s21 + $0x10] sm:$0xff]  ;;  %s956_s4 = sshll.u32 %s221_s29, 2  ;;  %s1597_s9 = sshll.u32 %s201_s8, 1 }
  0x1f   : > { %v242_v4 = vpack.c.bf16 %v227_v2, %v226_v1  ;;  %v229_v5 = vld [vmem:[%s212_s21 + $0x18] sm:$0xff]  ;;  %v230_v6 = vld [vmem:[%s212_s21 + $0x20] sm:$0xff]  ;;  %v231_v7 = vld [vmem:[%s212_s21 + $0x28] sm:$0xff]  ;;  %s1321_s7 = scalar_lea.vmem %s1706_s2, %s956_s4  ;;  %s983_s10 = sshll.u32 %s1188_s16, 1 }
  0x20   : > { %v243_v8 = vpack.c.bf16 %v229_v5, %v228_v3  ;;  %v244_v9 = vpack.c.bf16 %v231_v7, %v230_v6  ;;  %v234_v10 = vld [vmem:[%s212_s21 + $0x40] sm:$0xff]  ;;  %v235_v11 = vld [vmem:[%s212_s21 + $0x48] sm:$0xff]  ;;  %v236_v12 = vld [vmem:[%s212_s21 + $0x50] sm:$0xff]  ;;  %s822_s16 = sadd.s32 %s1184_s15, %s983_s10  ;;  %s203_s11 = scalar_lea.vmem [#allocation2], %s1597_s9 }
  0x21   : > { %1014 = vmatprep.mubr.msk.bf16.mxu0 %vm258_vm0, %v242_v4  ;;  %v237_v13 = vld [vmem:[%s212_s21 + $0x58] sm:$0xff]  ;;  %v246_v14 = vpack.c.bf16 %v235_v11, %v234_v10  ;;  %v238_v16 = vld [vmem:[%s212_s21 + $0x60] sm:$0xff]  ;;  %v239_v17 = vld [vmem:[%s212_s21 + $0x68] sm:$0xff]  ;;  %s984_s15 = sshll.u32 %s822_s16, 5  ;;  %s826_s20 = sshll.u32 %s203_s11, 4  ;;  %s1650_s20 = int_to_ptr.vmem [resolvable:$true] %s826_s20 }
  0x22   : > { %1015 = vmatmul.mubr.msk.bf16.vlgmr.msra.gmra.mrb[0].mxu0 %vm258_vm0, %v243_v8  ;;  %v247_v15 = vpack.c.bf16 %v237_v13, %v236_v12  ;;  %v232_v18 = vld [vmem:[%s212_s21 + $0x30] sm:$0xff]  ;;  %v233_v19 = vld [vmem:[%s212_s21 + $0x38] sm:$0xff]  ;;  %v248_v20 = vpack.c.bf16 %v239_v17, %v238_v16  ;;  %v698_v51 = vld [vmem:[%s1321_s7 + $0xc] sm:$0xf]  ;;  %s1648_s27 = scalar_lea.hbm %s1707_s3, %s984_s15  ;;  %s807_s28 = scalar_lea.sflag [#allocation3], %s201_s8 }
  0x23   : > { %1018 = vmatprep.mubr.msk.bf16.mxu0 %vm258_vm0, %v244_v9  ;;  %1022 = vmatprep.mubr.msk.bf16.mxu1 %vm258_vm0, %v246_v14  ;;  %v245_v21 = vpack.c.bf16 %v233_v19, %v232_v18  ;;  %v240_v22 = vld [vmem:[%s212_s21 + $0x70] sm:$0xff]  ;;  %v241_v23 = vld [vmem:[%s212_s21 + $0x78] sm:$0xff]  ;;  %v688_v59 = vld [vmem:[%s1321_s7] sm:$0xf]  ;;  %s1106_s29 = scalar_lea.vmem %s1650_s20, 32  ;;  %s1202_s4 = smov [#allocation2]  }
  0x24   : > { %1023 = vmatmul.mubr.msk.bf16.vlgmr.msra.gmra.mrb[0].mxu1 %vm258_vm0, %v247_v15  ;;  %v249_v24 = vpack.c.bf16 %v241_v23, %v240_v22  ;;  %p1107_p1 = scmp.ne.s32.totalorder %s1650_s20, %s1106_s29  ;;  %s1110_s5 = sshll.u32 %s1202_s4, 4  ;;  %s1111_s5 = int_to_ptr.vmem [resolvable:$false] %s1110_s5 }
  0x25   : > { %1026 = vmatprep.mubr.msk.bf16.mxu1 %vm258_vm0, %v248_v20  ;;  %s1112_s6 = scalar_lea.vmem %s1111_s5, 64  ;;  %p1113_p5 = scmp.lt.s32.totalorder %s1650_s20, %s1111_s5 }
  0x26   : > { %p1108_p2 = pnand %p1107_p1, %p1274_p3  ;;  %p1114_p6 = scmp.lt.s32.totalorder %s1112_s6, %s1106_s29 }
  0x28   : > { %p1109_p4 = pneg %p1108_p2  ;;  %p1115_p7 = por %p1114_p6, %p1113_p5 }
  0x2a   : > { %1019 = vmatmul.mubr.msk.bf16.gmra.mrb[4].mxu0 %vm258_vm0, %v245_v21  ;;  %p1116_p9 = pnand %p1115_p7, %p1109_p4 }
  0x2c   : > { %1027 = vmatmul.mubr.msk.bf16.gmra.mrb[4].mxu1 %vm258_vm0, %v249_v24 }
  0xf5   : > { %v1016_v25 = vpop.f32.mrb[0].mxu0 }
  0xf6   : > { %v422_v26 = vmul.f32 %v1016_v25, %v1016_v25  ;;  %v989_v27 = vpack.c.bf16 %v1016_v25, %v1016_v25  ;;  %v317_v28 = vpop.f32.mrb[1].mxu0  ;;  %v384_v29 = vsel %vm380_vm1, %v1016_v25, 0.0 }
  0xf7   : > { %v381_v30 = vsel %vm380_vm1, %v317_v28, 0.0  ;;  %v420_v31 = vmul.f32 %v317_v28, %v317_v28  ;;  %v987_v32 = vpack.c.bf16 %v317_v28, %v317_v28  ;;  %v1017_v33 = vpop.f32.mrb[2].mxu0  ;;  %v1325_v39 = vpop.f32.mrb[0].mxu1 }
  0xf8   : > { %v439_v34 = vsel %vm380_vm1, %v422_v26, 0.0  ;;  %v543_v35 = vshrl.u32 %v989_v27, 16  ;;  %v546_v36 = vshll.u32 %v989_v27, 16  ;;  %v386_v37 = vsel %vm380_vm1, %v1017_v33, 0.0  ;;  %v320_v38 = vpop.f32.mrb[3].mxu0  ;;  %v1328_v44 = vpop.f32.mrb[1].mxu1 }
  0xf9   : > { %v436_v40 = vsel %vm380_vm1, %v420_v31, 0.0  ;;  %v526_v41 = vshrl.u32 %v987_v32, 16  ;;  %v529_v42 = vshll.u32 %v987_v32, 16  ;;  %v423_v43 = vmul.f32 %v1017_v33, %v1017_v33  ;;  %v1331_v49 = vpop.f32.mrb[2].mxu1 }
  0xfa   : > { %v545_v45 = vrot.slane %v543_v35, 7  ;;  %v990_v46 = vpack.c.bf16 %v1017_v33, %v1017_v33  ;;  %v382_v47 = vsel %vm380_vm1, %v320_v38, 0.0  ;;  %v421_v48 = vmul.f32 %v320_v38, %v320_v38  ;;  %v1341_v56 = vpop.f32.mrb[3].mxu1 }
  0xfb   : > { %v528_v52 = vrot.slane %v526_v41, 7  ;;  %v441_v53 = vsel %vm380_vm1, %v423_v43, 0.0  ;;  %v383_v54 = vadd.f32 %v382_v47, %v381_v30  ;;  %v988_v55 = vpack.c.bf16 %v320_v38, %v320_v38 }
  0xfc   : > { %v548_v57 = vor.u32 %v546_v36, %v545_v45  ;;  %v549_v58 = vrot.slane %v545_v45, 4  ;;  %v551_v60 = vshrl.u32 %v990_v46, 16  ;;  %v554_v61 = vshll.u32 %v990_v46, 16  ;;  %v712_v45 = vld [vmem:[%s1321_s7 + $0x24] sm:$0xf] }
  0xfd   : > { %v531_v62 = vor.u32 %v529_v42, %v528_v52  ;;  %v532_v63 = vrot.slane %v528_v52, 4  ;;  %v385_v0 = vadd.f32 %v384_v29, %v383_v54  ;;  %v437_v1 = vsel %vm380_vm1, %v421_v48, 0.0  ;;  %v1020_v2 = vpop.f32.mrb[4].mxu0 }
  0xfe   : > { %v699_v3 = vsel %vm1335_vm6, %v548_v57, %v698_v51  ;;  %v1347_v4 = vrot.slane %v551_v60, 7  ;;  %v438_v5 = vadd.f32 %v437_v1, %v436_v40  ;;  %v534_v6 = vshrl.u32 %v988_v55, 16  ;;  %v333_v7 = vpop.f32.mrb[5].mxu0 }
  0xff   : > { %700 = vst [vmem:[%s1321_s7 + $0xc] sm:$0xf] %v699_v3  ;;  %v689_v8 = vsel %vm1335_vm6, %v531_v62, %v688_v59  ;;  %v537_v10 = vshll.u32 %v988_v55, 16  ;;  %v392_v11 = vsel %vm380_vm1, %v1020_v2, 0.0  ;;  %v426_v12 = vmul.f32 %v1020_v2, %v1020_v2  ;;  %v1021_v13 = vpop.f32.mrb[6].mxu0  ;;  %v1364_v19 = vpop.f32.mrb[4].mxu1 }
 0x100   : > { %690 = vst [vmem:[%s1321_s7] sm:$0xf] %v689_v8  ;;  %v556_v14 = vor.u32 %v554_v61, %v1347_v4  ;;  %v558_v15 = vrot.slane %v1347_v4, 4  ;;  %v440_v16 = vadd.f32 %v439_v34, %v438_v5  ;;  %v1362_v17 = vrot.slane %v534_v6, 7  ;;  %v336_v18 = vpop.f32.mrb[7].mxu0  ;;  %v1368_v24 = vpop.f32.mrb[5].mxu1 }
 0x101   : > { %v447_v20 = vsel %vm380_vm1, %v426_v12, 0.0  ;;  %v993_v21 = vpack.c.bf16 %v1020_v2, %v1020_v2  ;;  %v387_v22 = vadd.f32 %v386_v37, %v385_v0  ;;  %v388_v23 = vsel %vm380_vm1, %v333_v7, 0.0  ;;  %v1374_v29 = vpop.f32.mrb[6].mxu1  ;;  %v705_v62 = vld [vmem:[%s1321_s7 + $0x18] sm:$0xf] }
 0x102   : > { %v557_v25 = vsel %vm1354_vm7, %v549_v58, %v556_v14  ;;  %v539_v26 = vor.u32 %v537_v10, %v1362_v17  ;;  %v541_v27 = vrot.slane %v1362_v17, 4  ;;  %v424_v28 = vmul.f32 %v333_v7, %v333_v7  ;;  %v1378_v34 = vpop.f32.mrb[7].mxu1  ;;  %v723_v4 = vld [vmem:[%s1321_s7 + $0x38] sm:$0x1] }
 0x103   : > { %701 = vst.msk [vmem:[%s1321_s7 + $0x10] sm:$0xf] %vm685_vm2, %v557_v25  ;;  %v577_v30 = vshrl.u32 %v993_v21, 16  ;;  %v580_v31 = vshll.u32 %v993_v21, 16  ;;  %v389_v32 = vadd.f32 %v388_v23, %v387_v22  ;;  %v442_v33 = vadd.f32 %v441_v53, %v440_v16 }
 0x104   : > { %v540_v35 = vsel %vm1354_vm7, %v532_v63, %v539_v26  ;;  %v443_v36 = vsel %vm380_vm1, %v424_v28, 0.0  ;;  %v991_v37 = vpack.c.bf16 %v333_v7, %v333_v7  ;;  %v394_v38 = vsel %vm380_vm1, %v1021_v13, 0.0 }
 0x105   : > { %692 = vst.msk [vmem:[%s1321_s7 + $0x4] sm:$0xf] %vm685_vm2, %v540_v35  ;;  %v579_v40 = vrot.slane %v577_v30, 7  ;;  %v444_v41 = vadd.f32 %v443_v36, %v442_v33  ;;  %v427_v42 = vmul.f32 %v1021_v13, %v1021_v13  ;;  %v994_v43 = vpack.c.bf16 %v1021_v13, %v1021_v13 }
 0x106   : > { %v560_v46 = vshrl.u32 %v991_v37, 16  ;;  %v563_v47 = vshll.u32 %v991_v37, 16  ;;  %v390_v48 = vsel %vm380_vm1, %v336_v18, 0.0  ;;  %v425_v51 = vmul.f32 %v336_v18, %v336_v18 }
 0x107   : > { %v582_v52 = vor.u32 %v580_v31, %v579_v40  ;;  %v583_v53 = vrot.slane %v579_v40, 4  ;;  %v449_v54 = vsel %vm380_vm1, %v427_v42, 0.0  ;;  %v585_v55 = vshrl.u32 %v994_v43, 16  ;;  %v726_v40 = vld [vmem:[%s1321_s7 + $0x3c] sm:$0xf] }
 0x108   : > { %v562_v57 = vrot.slane %v560_v46, 7  ;;  %v588_v58 = vshll.u32 %v994_v43, 16  ;;  %v391_v59 = vadd.f32 %v390_v48, %v389_v32  ;;  %v445_v60 = vsel %vm380_vm1, %v425_v51, 0.0 }
 0x109   : > { %v713_v61 = vsel %vm1335_vm6, %v582_v52, %v712_v45  ;;  %v1393_v63 = vrot.slane %v585_v55, 7  ;;  %v446_v0 = vadd.f32 %v445_v60, %v444_v41  ;;  %v992_v1 = vpack.c.bf16 %v336_v18, %v336_v18 }
 0x10a   : > { %714 = vst [vmem:[%s1321_s7 + $0x24] sm:$0xf] %v713_v61  ;;  %v565_v2 = vor.u32 %v563_v47, %v562_v57  ;;  %v566_v3 = vrot.slane %v562_v57, 4  ;;  %v393_v5 = vadd.f32 %v392_v11, %v391_v59  ;;  %v400_v6 = vsel %vm380_vm1, %v1325_v39, 0.0 }
 0x10b   : > { %v590_v7 = vor.u32 %v588_v58, %v1393_v63  ;;  %v592_v8 = vrot.slane %v1393_v63, 4  ;;  %v448_v10 = vadd.f32 %v447_v20, %v446_v0  ;;  %v568_v12 = vshrl.u32 %v992_v1, 16  ;;  %v719_v58 = vld [vmem:[%s1321_s7 + $0x30] sm:$0xf] }
 0x10c   : > { %v706_v13 = vsel %vm1335_vm6, %v565_v2, %v705_v62  ;;  %v571_v14 = vshll.u32 %v992_v1, 16  ;;  %v430_v16 = vmul.f32 %v1325_v39, %v1325_v39  ;;  %v997_v18 = vpack.c.bf16 %v1325_v39, %v1325_v39 }
 0x10d   : > { %707 = vst [vmem:[%s1321_s7 + $0x18] sm:$0xf] %v706_v13  ;;  %v591_v11 = vsel %vm1354_vm7, %v583_v53, %v590_v7  ;;  %v1409_v21 = vrot.slane %v568_v12, 7  ;;  %v395_v22 = vadd.f32 %v394_v38, %v393_v5  ;;  %v396_v20 = vsel %vm380_vm1, %v1328_v44, 0.0 }
 0x10e   : > { %715 = vst.msk [vmem:[%s1321_s7 + $0x28] sm:$0xf] %vm685_vm2, %v591_v11  ;;  %v455_v23 = vsel %vm380_vm1, %v430_v16, 0.0  ;;  %v611_v25 = vshrl.u32 %v997_v18, 16  ;;  %v614_v26 = vshll.u32 %v997_v18, 16  ;;  %v428_v39 = vmul.f32 %v1328_v44, %v1328_v44 }
 0x10f   : > { %v573_v28 = vor.u32 %v571_v14, %v1409_v21  ;;  %v575_v30 = vrot.slane %v1409_v21, 4  ;;  %v397_v31 = vadd.f32 %v396_v20, %v395_v22  ;;  %v450_v32 = vadd.f32 %v449_v54, %v448_v10 }
 0x110   : > { %v613_v33 = vrot.slane %v611_v25, 7  ;;  %v451_v35 = vsel %vm380_vm1, %v428_v39, 0.0  ;;  %v995_v36 = vpack.c.bf16 %v1328_v44, %v1328_v44  ;;  %v402_v37 = vsel %vm380_vm1, %v1331_v49, 0.0 }
 0x111   : > { %v574_v38 = vsel %vm1354_vm7, %v566_v3, %v573_v28  ;;  %v452_v41 = vadd.f32 %v451_v35, %v450_v32  ;;  %v431_v42 = vmul.f32 %v1331_v49, %v1331_v49  ;;  %v998_v43 = vpack.c.bf16 %v1331_v49, %v1331_v49 }
 0x112   : > { %708 = vst.msk [vmem:[%s1321_s7 + $0x1c] sm:$0xf] %vm685_vm2, %v574_v38  ;;  %v616_v45 = vor.u32 %v614_v26, %v613_v33  ;;  %v617_v44 = vrot.slane %v613_v33, 4  ;;  %v594_v46 = vshrl.u32 %v995_v36, 16  ;;  %v597_v47 = vshll.u32 %v995_v36, 16 }
 0x113   : > { %v457_v48 = vsel %vm380_vm1, %v431_v42, 0.0  ;;  %v619_v51 = vshrl.u32 %v998_v43, 16  ;;  %v622_v52 = vshll.u32 %v998_v43, 16  ;;  %v398_v53 = vsel %vm380_vm1, %v1341_v56, 0.0  ;;  %v740_v38 = vld [vmem:[%s1321_s7 + $0x54] sm:$0xf] }
 0x114   : > { %v727_v54 = vsel %vm1335_vm6, %v616_v45, %v726_v40  ;;  %v596_v55 = vrot.slane %v594_v46, 7  ;;  %v399_v49 = vadd.f32 %v398_v53, %v397_v31  ;;  %v429_v57 = vmul.f32 %v1341_v56, %v1341_v56  ;;  %v695_v43 = vld [vmem:[%s1321_s7 + $0x8] sm:$0x1] }
 0x115   : > { %728 = vst [vmem:[%s1321_s7 + $0x3c] sm:$0xf] %v727_v54  ;;  %v1443_v59 = vrot.slane %v619_v51, 7  ;;  %v996_v60 = vpack.c.bf16 %v1341_v56, %v1341_v56  ;;  %v408_v61 = vsel %vm380_vm1, %v1364_v19, 0.0  ;;  %v434_v62 = vmul.f32 %v1364_v19, %v1364_v19 }
 0x116   : > { %v599_v0 = vor.u32 %v597_v47, %v596_v55  ;;  %v600_v1 = vrot.slane %v596_v55, 4  ;;  %v401_v2 = vadd.f32 %v400_v6, %v399_v49  ;;  %v453_v3 = vsel %vm380_vm1, %v429_v57, 0.0 }
 0x117   : > { %v624_v5 = vor.u32 %v622_v52, %v1443_v59  ;;  %v626_v7 = vrot.slane %v1443_v59, 4  ;;  %v454_v10 = vadd.f32 %v453_v3, %v452_v41  ;;  %v602_v12 = vshrl.u32 %v996_v60, 16 }
 0x118   : > { %v720_v56 = vsel %vm1335_vm6, %v599_v0, %v719_v58  ;;  %v605_v13 = vshll.u32 %v996_v60, 16  ;;  %v1457_v14 = vsel %vm380_vm1, %v434_v62, 0.0  ;;  %v1001_v16 = vpack.c.bf16 %v1364_v19, %v1364_v19  ;;  %v733_v58 = vld [vmem:[%s1321_s7 + $0x48] sm:$0xf] }
 0x119   : > { %721 = vst [vmem:[%s1321_s7 + $0x30] sm:$0xf] %v720_v56  ;;  %v625_v6 = vsel %vm1354_vm7, %v617_v44, %v624_v5  ;;  %v456_v18 = vadd.f32 %v455_v23, %v454_v10  ;;  %v1464_v11 = vrot.slane %v602_v12, 7  ;;  %v403_v22 = vadd.f32 %v402_v37, %v401_v2  ;;  %v709_v2 = vld [vmem:[%s1321_s7 + $0x20] sm:$0x1] }
 0x11a   : > { %729 = vst.msk [vmem:[%s1321_s7 + $0x40] sm:$0xf] %vm685_vm2, %v625_v6  ;;  %v645_v20 = vshrl.u32 %v1001_v16, 16  ;;  %v648_v25 = vshll.u32 %v1001_v16, 16  ;;  %v404_v26 = vsel %vm380_vm1, %v1368_v24, 0.0  ;;  %v432_v19 = vmul.f32 %v1368_v24, %v1368_v24 }
 0x11b   : > { %v607_v39 = vor.u32 %v605_v13, %v1464_v11  ;;  %v609_v23 = vrot.slane %v1464_v11, 4  ;;  %v405_v28 = vadd.f32 %v404_v26, %v403_v22  ;;  %v458_v31 = vadd.f32 %v457_v48, %v456_v18  ;;  %v702_v48 = vld [vmem:[%s1321_s7 + $0x14] sm:$0x1]  ;;  %v730_v13 = vld [vmem:[%s1321_s7 + $0x44] sm:$0x1] }
 0x11c   : > { %v647_v32 = vrot.slane %v645_v20, 7  ;;  %v459_v33 = vsel %vm380_vm1, %v432_v19, 0.0  ;;  %v999_v35 = vpack.c.bf16 %v1368_v24, %v1368_v24  ;;  %v410_v36 = vsel %vm380_vm1, %v1374_v29, 0.0  ;;  %v744_v16 = vld [vmem:[%s1321_s7 + $0x5c] sm:$0x1] }
 0x11d   : > { %v608_v37 = vsel %vm1354_vm7, %v600_v1, %v607_v39  ;;  %v460_v40 = vadd.f32 %v459_v33, %v458_v31  ;;  %v435_v41 = vmul.f32 %v1374_v29, %v1374_v29  ;;  %v1002_v42 = vpack.c.bf16 %v1374_v29, %v1374_v29  ;;  %v750_v6 = vld [vmem:[%s1321_s7 + $0xc] sm:$0x1]  ;;  %v756_v26 = vld [vmem:[%s1321_s7 + $0x24] sm:$0x1]  ;;  %v753_v19 = vld [vmem:[%s1321_s7 + $0x18] sm:$0x1] }
 0x11e   : > { %722 = vst.msk [vmem:[%s1321_s7 + $0x34] sm:$0xf] %vm685_vm2, %v608_v37  ;;  %v650_v24 = vor.u32 %v648_v25, %v647_v32  ;;  %v651_v45 = vrot.slane %v647_v32, 4  ;;  %v628_v44 = vshrl.u32 %v999_v35, 16  ;;  %v631_v46 = vshll.u32 %v999_v35, 16 }
 0x11f   : > { %v465_v51 = vsel %vm380_vm1, %v435_v41, 0.0  ;;  %v653_v29 = vshrl.u32 %v1002_v42, 16  ;;  %v656_v52 = vshll.u32 %v1002_v42, 16  ;;  %v406_v53 = vsel %vm380_vm1, %v1378_v34, 0.0  ;;  %v737_v32 = vld [vmem:[%s1321_s7 + $0x50] sm:$0x1] }
 0x120   : > { %v741_v54 = vsel %vm1335_vm6, %v650_v24, %v740_v38  ;;  %v1501_v55 = vrot.slane %v628_v44, 7  ;;  %v407_v49 = vadd.f32 %v406_v53, %v405_v28  ;;  %v433_v57 = vmul.f32 %v1378_v34, %v1378_v34  ;;  %v762_v33 = vld [vmem:[%s1321_s7 + $0x3c] sm:$0x1] }
 0x121   : > { %742 = vst [vmem:[%s1321_s7 + $0x54] sm:$0xf] %v741_v54  ;;  %v655_v60 = vrot.slane %v653_v29, 7  ;;  %v1000_v62 = vpack.c.bf16 %v1378_v34, %v1378_v34  ;;  %v696_v0 = vsel %vm1491_vm9, %v541_v27, %v695_v43  ;;  %v703_v1 = vsel %vm1491_vm9, %v558_v15, %v702_v48  ;;  %v716_v27 = vld [vmem:[%s1321_s7 + $0x2c] sm:$0x1] }
 0x122   : > { %v633_v3 = vor.u32 %v631_v46, %v1501_v55  ;;  %v634_v5 = vrot.slane %v1501_v55, 4  ;;  %v409_v34 = vadd.f32 %v408_v61, %v407_v49  ;;  %v461_v17 = vsel %vm380_vm1, %v433_v57, 0.0  ;;  %697 = vst [vmem:[%s1321_s7 + $0x8] sm:$0x1] %v696_v0  ;;  %704 = vst [vmem:[%s1321_s7 + $0x14] sm:$0x1] %v703_v1 }
 0x123   : > { %v658_v10 = vor.u32 %v656_v52, %v655_v60  ;;  %v660_v12 = vrot.slane %v655_v60, 4  ;;  %v462_v15 = vadd.f32 %v461_v17, %v460_v40  ;;  %v636_v56 = vshrl.u32 %v1000_v62, 16  ;;  %v747_v61 = vld [vmem:[%s1321_s7] sm:$0x1] }
 0x124   : > { %v734_v18 = vsel %vm1335_vm6, %v633_v3, %v733_v58  ;;  %v411_v22 = vadd.f32 %v410_v36, %v409_v34  ;;  %v639_v20 = vshll.u32 %v1000_v62, 16  ;;  %v710_v25 = vsel %vm1491_vm9, %v575_v30, %v709_v2  ;;  %v759_v30 = vld [vmem:[%s1321_s7 + $0x30] sm:$0x1] }
 0x125   : > { %735 = vst [vmem:[%s1321_s7 + $0x48] sm:$0xf] %v734_v18  ;;  %v659_v39 = vsel %vm1354_vm7, %v651_v45, %v658_v10  ;;  %v464_v28 = vadd.f32 %v1457_v14, %v462_v15  ;;  %v638_v50 = vrot.slane %v636_v56, 7  ;;  %711 = vst [vmem:[%s1321_s7 + $0x20] sm:$0x1] %v710_v25  ;;  %v717_v21 = vsel %vm1491_vm9, %v592_v8, %v716_v27 }
 0x126   : > { %743 = vst.msk [vmem:[%s1321_s7 + $0x58] sm:$0xf] %vm685_vm2, %v659_v39  ;;  %v412_v31 = vrot.slane %v411_v22, 4  ;;  %718 = vst [vmem:[%s1321_s7 + $0x2c] sm:$0x1] %v717_v21  ;;  %v724_v14 = vsel %vm1491_vm9, %v609_v23, %v723_v4  ;;  %v731_v63 = vsel %vm1491_vm9, %v626_v7, %v730_v13  ;;  %v745_v8 = vsel %vm1491_vm9, %v660_v12, %v744_v16 }
 0x127   : > { %v466_v35 = vadd.f32 %v465_v51, %v464_v28  ;;  %v641_v36 = vor.u32 %v639_v20, %v638_v50  ;;  %v643_v37 = vrot.slane %v638_v50, 4  ;;  %725 = vst [vmem:[%s1321_s7 + $0x38] sm:$0x1] %v724_v14  ;;  %732 = vst [vmem:[%s1321_s7 + $0x44] sm:$0x1] %v731_v63  ;;  %v748_v59 = vsel %vm1491_vm9, 0, %v747_v61 }
 0x128   : > { %746 = vst [vmem:[%s1321_s7 + $0x5c] sm:$0x1] %v745_v8  ;;  %v768_v11 = vld [vmem:[%s1321_s7 + $0x54] sm:$0x1]  ;;  %v413_v23 = vadd.f32 %v412_v31, %v411_v22  ;;  %749 = vst [vmem:[%s1321_s7] sm:$0x1] %v748_v59  ;;  %v751_v38 = vsel %vm1491_vm9, 0, %v750_v6 }
 0x129   : > { %v754_v40 = vsel %vm1491_vm9, 0, %v753_v19  ;;  %v757_v41 = vsel %vm1491_vm9, 0, %v756_v26  ;;  %v467_v42 = vrot.slane %v466_v35, 4  ;;  %v642_v43 = vsel %vm1354_vm7, %v634_v5, %v641_v36  ;;  %752 = vst [vmem:[%s1321_s7 + $0xc] sm:$0x1] %v751_v38 }
 0x12a   : > { %v738_v24 = vsel %vm1491_vm9, %v643_v37, %v737_v32  ;;  %755 = vst [vmem:[%s1321_s7 + $0x18] sm:$0x1] %v754_v40  ;;  %758 = vst [vmem:[%s1321_s7 + $0x24] sm:$0x1] %v757_v41  ;;  %v760_v45 = vsel %vm1491_vm9, 0, %v759_v30  ;;  %v414_v48 = vrot.slane %v413_v23, 2 }
 0x12b   : > { %v772_v44 = vld [vmem:[%s1321_s7 + $0x8] sm:$0x1]  ;;  %v775_v46 = vld [vmem:[%s1321_s7 + $0x14] sm:$0x1]  ;;  %736 = vst.msk [vmem:[%s1321_s7 + $0x4c] sm:$0xf] %vm685_vm2, %v642_v43  ;;  %v468_v52 = vadd.f32 %v467_v42, %v466_v35 }
 0x12c   : > { %739 = vst [vmem:[%s1321_s7 + $0x50] sm:$0x1] %v738_v24  ;;  %761 = vst [vmem:[%s1321_s7 + $0x30] sm:$0x1] %v760_v45  ;;  %v763_v9 = vsel %vm1491_vm9, 0, %v762_v33  ;;  %v769_v51 = vsel %vm1491_vm9, 0, %v768_v11  ;;  %v415_v55 = vadd.f32 %v414_v48, %v413_v23 }
 0x12d   : > { %v773_v29 = vsel %vm1570_vm10, 0, %v772_v44  ;;  %764 = vst [vmem:[%s1321_s7 + $0x3c] sm:$0x1] %v763_v9  ;;  %770 = vst [vmem:[%s1321_s7 + $0x54] sm:$0x1] %v769_v51  ;;  %v776_v53 = vsel %vm1570_vm10, 0, %v775_v46 }
 0x12e   : > { %774 = vst [vmem:[%s1321_s7 + $0x8] sm:$0x1] %v773_v29  ;;  %v765_v54 = vld [vmem:[%s1321_s7 + $0x48] sm:$0x1]  ;;  %777 = vst [vmem:[%s1321_s7 + $0x14] sm:$0x1] %v776_v53 }
 0x12f   : > { %v778_v49 = vld [vmem:[%s1321_s7 + $0x20] sm:$0x1]  ;;  %v469_v57 = vrot.slane %v468_v52, 2  ;;  %v766_v58 = vsel %vm1491_vm9, 0, %v765_v54  ;;  %v781_v62 = vld [vmem:[%s1321_s7 + $0x2c] sm:$0x1] }
 0x130   : > { %v779_v60 = vsel %vm1570_vm10, 0, %v778_v49  ;;  %v416_v0 = vrot.slane %v415_v55, 1  ;;  %767 = vst [vmem:[%s1321_s7 + $0x48] sm:$0x1] %v766_v58  ;;  %v782_v1 = vsel %vm1570_vm10, 0, %v781_v62 }
 0x131   : > { %780 = vst [vmem:[%s1321_s7 + $0x20] sm:$0x1] %v779_v60  ;;  %v784_v2 = vld [vmem:[%s1321_s7 + $0x38] sm:$0x1]  ;;  %v787_v3 = vld [vmem:[%s1321_s7 + $0x44] sm:$0x1]  ;;  %v470_v47 = vadd.f32 %v469_v57, %v468_v52 }
 0x132   : > { %783 = vst [vmem:[%s1321_s7 + $0x2c] sm:$0x1] %v782_v1  ;;  %v785_v5 = vsel %vm1570_vm10, 0, %v784_v2  ;;  %v788_v34 = vsel %vm1570_vm10, 0, %v787_v3  ;;  %v793_v17 = vld [vmem:[%s1321_s7 + $0x5c] sm:$0x1]  ;;  %v417_v27 = vadd.f32 %v416_v0, %v415_v55 }
 0x133   : > { %786 = vst [vmem:[%s1321_s7 + $0x38] sm:$0x1] %v785_v5  ;;  %789 = vst [vmem:[%s1321_s7 + $0x44] sm:$0x1] %v788_v34  ;;  %v794_v4 = vsel %vm1570_vm10, 0, %v793_v17  ;;  %v471_v10 = vrot.slane %v470_v47, 1 }
 0x134   : > { %v790_v12 = vld [vmem:[%s1321_s7 + $0x50] sm:$0x1]  ;;  %795 = vst [vmem:[%s1321_s7 + $0x5c] sm:$0x1] %v794_v4  ;;  %419 = vst.msk [vmem:[%s203_s11] sm:$0x1] %vm418_vm8, %v417_v27 }
 0x135   : > { %v791_v15 = vsel %vm1570_vm10, 0, %v790_v12  ;;  %v472_v56 = vadd.f32 %v471_v10, %v470_v47 }
 0x136   : > { %792 = vst [vmem:[%s1321_s7 + $0x50] sm:$0x1] %v791_v15 }
 0x137   : > { %473 = vst.msk [vmem:[%s203_s11 + $0x1] sm:$0x1] %vm418_vm8, %v472_v56 }
 0x138   : > { %1119 = shalt.err (!%p1116_p9)
}
 0x139   : > { %s1120_s7 = scalar_lea.hbm %s1648_s27, 32  ;;  %s1124_s10 = scalar_lea.hbm %s1707_s3, 128 }
 0x13a   : > { %p1121_p10 = scmp.ne.s32.totalorder %s1648_s27, %s1120_s7  ;;  %p1125_p13 = scmp.lt.u32.totalorder %s1648_s27, %s1707_s3 }
 0x13b   : > { %p1126_p0 = scmp.lt.u32.totalorder %s1124_s10, %s1120_s7  ;;  %p1128_p2 = scmp.lt.u32.totalorder %s1120_s7, %s1648_s27 }
 0x13c   : > { %p1122_p11 = pnand %p1121_p10, %p1274_p3 }
 0x13d   : > { %p1127_p1 = por %p1126_p0, %p1125_p13 }
 0x13e   : > { %p1123_p12 = pneg %p1122_p11 }
 0x13f   : > { %p1129_p4 = por %p1128_p2, %p1127_p1 }
 0x141   : > { %p1130_p5 = pnand %p1129_p4, %p1123_p12 }
 0x143   : > { %1133 = shalt.err (!%p1130_p5)
}
 0x144   : > { %1034 = dma.vmem_to_hbm [thread:$0]  (%p1274_p3), %s1650_s20, 32, %s1648_s27, %s807_s28  }
 0x145 PF: > { %p1040_p6 = scmp.ge.s32.totalorder %s1200_s19, 2  ;;  %s851_s11 = sand.u32 1, %s1172_s12  }
 0x146   : > { %s852_s21 = scalar_lea.sflag [#allocation3], %s851_s11 }
 0x147   : > { %p1037_p7 = pnand %p1040_p6, %p1283_p8 }
 0x149   : > { %1167 = dma.done.wait (!%p1037_p7), %s852_s21, 32  }
 0x14a   : > { %1169 = vsyncadd (!%p1037_p7), %s852_s21, 4294967264  ;;  %s17_s19 = sadd.s32 1, %s1200_s19   ;;  %s1718_s12 = smov %s1176_s13 }
 0x14b   : > { %p14_p9 = scmp.ge.s32.totalorder %s17_s19, 6   ;;  %s1719_s13 = smov %s1180_s14 }
 0x14c   : > { %s1720_s14 = smov %s1292_s30  ;;  %s1721_s15 = smov %s1192_s17 }
 0x14d   : > { %s1722_s16 = smov %s1196_s18  ;;  %s1723_s17 = smov %s1726_s22 }
 0x14e   : > { %s1724_s18 = smov %s1730_s23  ;;  %16 = sbr.rel (!%p14_p9) target bundleno = 5 (0x5), region = 75 }
 0x155   :  { %857 = vsyncpa [#allocation3], 1 }
 0x156   :  { %859 = vsyncpa [#allocation3 + $0x1], 1 }

</bundles_post_ra>
